<compile_context>
chip_gen: v6e
topology: v6e:2x2x1
jax: 0.10.0
libtpu: 0.0.40
codegen_flags: <defaults>
</compile_context>

<pallas_src>
import numpy as np
import jax
import jax.numpy as jnp
from jax.experimental import pallas as pl
from jax.experimental.pallas import tpu as pltpu

# ----- problem sizes (small, consistent with the module) -----
B = 2                        # batch
T = 32                       # sequence length fed to each encoder (divisible by 4)
H = 32                       # hidden_dim
INPUT_DIMS = (4, 6, 8)       # (eeg, eye, pose) channel counts
C_TOT = sum(INPUT_DIMS)      # 18
C3 = 3 * H                   # 96  (concat of the 3 modality hidden channels)
K = 5                        # Conv1d kernel_size
STRIDE = 2
L1 = (T - K) // STRIDE + 1   # 14 (after conv1)
L2 = (L1 - K) // STRIDE + 1  # 5  (after conv2)
R1 = L1 // 2                 # 7  (conv1 output stored as time-pairs)
LANES = 2 * C3               # 192 (slab lane width)


def _ru8(n):
    return (n + 7) // 8 * 8


# parameter-slab row offsets (each section 8-row aligned)
OFF_W1 = 0                                   # (2*K*C_TOT, 192) paired block-diag conv1 weight
OFF_B1 = _ru8(OFF_W1 + 2 * K * C_TOT)        # 184: row of paired conv1 bias (192)
OFF_W2 = _ru8(OFF_B1 + 1)                    # 192: (K*C3, 96) block-diag conv2 weight
OFF_B2 = _ru8(OFF_W2 + K * C3)               # 672: row of conv2 bias (96)
OFF_WF1 = _ru8(OFF_B2 + 1)                   # 680: (96, 32) fusion layer-1 weight
OFF_BF1 = _ru8(OFF_WF1 + C3)                 # 776: row of fusion layer-1 bias (32)
OFF_WF2 = _ru8(OFF_BF1 + 1)                  # 784: row of fusion layer-2 weight (32)
OFF_BF2 = _ru8(OFF_WF2 + 1)                  # 792: fusion layer-2 bias scalar at [row, 0]
TOTAL_ROWS = _ru8(OFF_BF2 + 1)               # 800


def multimodal_fusion_kernel(xq_ref, p_ref, out_ref):
    # packed input: xq[b, q, p*C_TOT + c] == x_cat[b, 4*q + p, c],  shape (B, T//4, 4*C_TOT)
    x = xq_ref[...]

    # --- parameters (read once, static slices of the single slab) ---
    w1 = p_ref[OFF_W1:OFF_W1 + 2 * K * C_TOT, :]        # (180, 192)
    b1 = p_ref[OFF_B1:OFF_B1 + 1, :]                    # (1, 192)
    w2 = p_ref[OFF_W2:OFF_W2 + K * C3, 0:C3]            # (480, 96)
    b2 = p_ref[OFF_B2:OFF_B2 + 1, 0:C3]                 # (1, 96)
    wf1 = p_ref[OFF_WF1:OFF_WF1 + C3, 0:H]              # (96, 32)
    bf1 = p_ref[OFF_BF1:OFF_BF1 + 1, 0:H]               # (1, 32)
    wf2 = p_ref[OFF_WF2:OFF_WF2 + 1, 0:H]               # (1, 32)
    bf2 = p_ref[OFF_BF2:OFF_BF2 + 1, 0:1]               # (1, 1)

    # --- conv1 (kernel 5, stride 2, valid) as a single im2col matmul -------------------------
    # Paired layout: P[b*R1 + r, pair*K*C_TOT + k*C_TOT + c] = x_cat[b, 4r + 2*pair + k, c]
    # All slices below are contiguous (unit stride) thanks to the host-side quad reshape.
    p_rows = []
    for b in range(B):
        cols = []
        for pair in range(2):
            for k in range(K):
                j = 2 * pair + k                      # 0..6  -> input row 4r + j
                cols.append(x[b, j // 4: j // 4 + R1,
                              (j % 4) * C_TOT: (j % 4 + 1) * C_TOT])
        p_rows.append(jnp.concatenate(cols, axis=1))  # (7, 180)
    patches1 = jnp.concatenate(p_rows, axis=0)        # (B*7, 180)

    # a[b*R1 + r, pair*C3 + (m*H + h)] = relu(conv1)_m[b, 2r + pair, h]
    a = jnp.maximum(
        jnp.dot(patches1, w1, preferred_element_type=jnp.float32) + b1, 0.0)   # (14, 192)
    # dropout: identity (eval mode)

    # --- conv2 (kernel 5, stride 2, valid) as a single im2col matmul -------------------------
    # Q[b*L2 + l, k*C3 + j] = conv1_out[b, 2l + k, j] = a[b*R1 + l + k//2, (k%2)*C3 + j]
    q_rows = []
    for b in range(B):
        cols = []
        for k in range(K):
            r0 = b * R1 + k // 2
            c0 = (k % 2) * C3
            cols.append(a[r0:r0 + L2, c0:c0 + C3])    # (5, 96)
        q_rows.append(jnp.concatenate(cols, axis=1))  # (5, 480)
    patches2 = jnp.concatenate(q_rows, axis=0)        # (B*5, 480)

    c = jnp.maximum(
        jnp.dot(patches2, w2, preferred_element_type=jnp.float32) + b2, 0.0)   # (10, 96)
    # dropout: identity (eval mode)

    # --- AdaptiveAvgPool1d(1) per batch -> (B, 3H); this IS torch.cat([f_eeg,f_eye,f_pose]) ---
    comb = jnp.concatenate(
        [jnp.mean(c[b * L2:(b + 1) * L2, :], axis=0, keepdims=True) for b in range(B)],
        axis=0)                                        # (B, 96)

    # --- fusion MLP ---------------------------------------------------------------------------
    hidden = jnp.maximum(
        jnp.dot(comb, wf1, preferred_element_type=jnp.float32) + bf1, 0.0)     # (B, 32)
    # dropout: identity (eval mode)
    # final Linear(H -> 1): VPU multiply + lane reduction (avoids an N=1 MXU matmul)
    out_ref[...] = jnp.sum(hidden * wf2, axis=1, keepdims=True) + bf2          # (B, 1)


# ------------------------------- host-side packing helpers -------------------------------------

def pack_inputs(x0, x1, x2):
    """Concat modalities on channels and fold time into quads -> (B, T//4, 4*C_TOT)."""
    x_cat = jnp.concatenate([x0, x1, x2], axis=-1)     # (B, T, 18)
    return x_cat.reshape(B, T // 4, 4 * C_TOT)


def pack_params(params):
    """Pack the 16 natural parameter arrays into one (TOTAL_ROWS, LANES) f32 slab."""
    (w1_0, b1_0, w2_0, b2_0,
     w1_1, b1_1, w2_1, b2_1,
     w1_2, b1_2, w2_2, b2_2,
     wf1, bf1, wf2, bf2) = [np.asarray(p, np.float32) for p in params]

    # conv1: modality block-diagonal (K*C_TOT, 3H), then paired block-diagonal (2*K*C_TOT, 2*3H)
    w1bd = np.zeros((K * C_TOT, C3), np.float32)
    coff = 0
    for m, (w1m, cin) in enumerate(zip((w1_0, w1_1, w1_2), INPUT_DIMS)):
        for k in range(K):
            w1bd[k * C_TOT + coff: k * C_TOT + coff + cin, m * H:(m + 1) * H] = w1m[k]
        coff += cin
    w1dd = np.zeros((2 * K * C_TOT, 2 * C3), np.float32)
    w1dd[:K * C_TOT, :C3] = w1bd
    w1dd[K * C_TOT:, C3:] = w1bd

    # conv2: modality block-diagonal (K*3H, 3H)
    w2bd = np.zeros((K * C3, C3), np.float32)
    for m, w2m in enumerate((w2_0, w2_1, w2_2)):
        for k in range(K):
            w2bd[k * C3 + m * H: k * C3 + (m + 1) * H, m * H:(m + 1) * H] = w2m[k]

    b1cat = np.concatenate([b1_0, b1_1, b1_2], axis=1)          # (1, 96)
    b1pair = np.concatenate([b1cat, b1cat], axis=1)             # (1, 192)
    b2cat = np.concatenate([b2_0, b2_1, b2_2], axis=1)          # (1, 96)

    slab = np.zeros((TOTAL_ROWS, LANES), np.float32)
    slab[OFF_W1:OFF_W1 + 2 * K * C_TOT, :] = w1dd
    slab[OFF_B1, :] = b1pair[0]
    slab[OFF_W2:OFF_W2 + K * C3, :C3] = w2bd
    slab[OFF_B2, :C3] = b2cat[0]
    slab[OFF_WF1:OFF_WF1 + C3, :H] = wf1
    slab[OFF_BF1, :H] = bf1[0]
    slab[OFF_WF2, :H] = wf2[:, 0]
    slab[OFF_BF2, 0] = bf2[0, 0]
    return jnp.asarray(slab)


def multimodal_fusion(x0, x1, x2, params):
    """params = flat list of 16 arrays (see init_params). Returns (B, 1) float32."""
    xq = pack_inputs(x0, x1, x2)
    slab = pack_params(params)
    return pl.pallas_call(
        multimodal_fusion_kernel,
        out_shape=jax.ShapeDtypeStruct((B, 1), jnp.float32),
        in_specs=[pl.BlockSpec(memory_space=pltpu.MemorySpace.VMEM),
                  pl.BlockSpec(memory_space=pltpu.MemorySpace.VMEM)],
        out_specs=pl.BlockSpec(memory_space=pltpu.MemorySpace.VMEM),
    )(xq, slab)


# ------------------------------- params + pure-JAX reference -----------------------------------

def init_params(key):
    """Deterministic synthetic parameters in 'natural' layout.

    Per encoder: w1 (K, Cin, H), b1 (1, H), w2 (K, H, H), b2 (1, H)
    Fusion:      wf1 (3H, H),    bf1 (1, H), wf2 (H, 1),  bf2 (1, 1)
    (Conv weights stored transposed vs. PyTorch's (Cout, Cin, K); Linear weights transposed
     vs. PyTorch's (out, in).)
    """
    keys = jax.random.split(key, 16)
    params = []
    i = 0
    for cin in INPUT_DIMS:
        params.append(jax.random.normal(keys[i], (K, cin, H), jnp.float32) * 0.1); i += 1
        params.append(jax.random.normal(keys[i], (1, H), jnp.float32) * 0.01);     i += 1
        params.append(jax.random.normal(keys[i], (K, H, H), jnp.float32) * 0.1);   i += 1
        params.append(jax.random.normal(keys[i], (1, H), jnp.float32) * 0.01);     i += 1
    params.append(jax.random.normal(keys[i], (3 * H, H), jnp.float32) * 0.1); i += 1
    params.append(jax.random.normal(keys[i], (1, H), jnp.float32) * 0.01);    i += 1
    params.append(jax.random.normal(keys[i], (H, 1), jnp.float32) * 0.1);     i += 1
    params.append(jax.random.normal(keys[i], (1, 1), jnp.float32) * 0.01);    i += 1
    return params


def reference(x0, x1, x2, params):
    """Pure-JAX reference of the PyTorch forward (eval mode)."""
    dn = ('NWC', 'WIO', 'NWC')

    def enc(x, w1, b1, w2, b2):
        h = jax.lax.conv_general_dilated(x, w1, (STRIDE,), 'VALID', dimension_numbers=dn)
        h = jnp.maximum(h + b1, 0.0)
        h = jax.lax.conv_general_dilated(h, w2, (STRIDE,), 'VALID', dimension_numbers=dn)
        h = jnp.maximum(h + b2, 0.0)
        return jnp.mean(h, axis=1)                      # AdaptiveAvgPool1d(1) + squeeze

    (w1_0, b1_0, w2_0, b2_0,
     w1_1, b1_1, w2_1, b2_1,
     w1_2, b1_2, w2_2, b2_2,
     wf1, bf1, wf2, bf2) = params
    f0 = enc(x0, w1_0, b1_0, w2_0, b2_0)
    f1 = enc(x1, w1_1, b1_1, w2_1, b2_1)
    f2 = enc(x2, w1_2, b1_2, w2_2, b2_2)
    comb = jnp.concatenate([f0, f1, f2], axis=1)        # (B, 3H)
    hidden = jnp.maximum(comb @ wf1 + bf1, 0.0)
    return hidden @ wf2 + bf2                           # (B, 1)


if __name__ == "__main__":
    key = jax.random.PRNGKey(0)
    k0, k1, k2, kp = jax.random.split(key, 4)
    x_eeg = jax.random.normal(k0, (B, T, INPUT_DIMS[0]), jnp.float32)
    x_eye = jax.random.normal(k1, (B, T, INPUT_DIMS[1]), jnp.float32)
    x_pose = jax.random.normal(k2, (B, T, INPUT_DIMS[2]), jnp.float32)
    params = init_params(kp)

    out = multimodal_fusion(x_eeg, x_eye, x_pose, params)
    out = jax.block_until_ready(out)

    ref = reference(x_eeg, x_eye, x_pose, params)
    assert out.shape == (B, 1), out.shape
    assert bool(jnp.all(jnp.isfinite(out)))
    assert bool(jnp.allclose(out, ref, atol=2e-3, rtol=2e-3)), (out, ref)
    print("KERNEL_OK")
</pallas_src>

<mosaic_0001>
module attributes {stable_mosaic.version = 11 : i64} {
  func.func @multimodal_fusion_kernel(%arg0: memref<2x8x72xf32, #tpu.memory_space<vmem>>, %arg1: memref<800x192xf32, #tpu.memory_space<vmem>>, %arg2: memref<2x1xf32, #tpu.memory_space<vmem>>) attributes {dimension_semantics = [], scalar_prefetch = 0 : i64, scratch_operands = 0 : i64, tpu.core_type = #tpu.core_type<tc>} {
    %c0 = arith.constant 0 : index
    %c0_0 = arith.constant 0 : index
    %c0_1 = arith.constant 0 : index
    %0 = vector.load %arg0[%c0, %c0_0, %c0_1] : memref<2x8x72xf32, #tpu.memory_space<vmem>>, vector<2x8x72xf32>
    %c0_2 = arith.constant 0 : index
    %c0_3 = arith.constant 0 : index
    %1 = vector.load %arg1[%c0_2, %c0_3] : memref<800x192xf32, #tpu.memory_space<vmem>>, vector<180x192xf32>
    %c184 = arith.constant 184 : index
    %c0_4 = arith.constant 0 : index
    %2 = vector.load %arg1[%c184, %c0_4] : memref<800x192xf32, #tpu.memory_space<vmem>>, vector<1x192xf32>
    %c192 = arith.constant 192 : index
    %c0_5 = arith.constant 0 : index
    %3 = vector.load %arg1[%c192, %c0_5] : memref<800x192xf32, #tpu.memory_space<vmem>>, vector<480x96xf32>
    %c672 = arith.constant 672 : index
    %c0_6 = arith.constant 0 : index
    %4 = vector.load %arg1[%c672, %c0_6] : memref<800x192xf32, #tpu.memory_space<vmem>>, vector<1x96xf32>
    %c680 = arith.constant 680 : index
    %c0_7 = arith.constant 0 : index
    %5 = vector.load %arg1[%c680, %c0_7] : memref<800x192xf32, #tpu.memory_space<vmem>>, vector<96x32xf32>
    %c776 = arith.constant 776 : index
    %c0_8 = arith.constant 0 : index
    %6 = vector.load %arg1[%c776, %c0_8] : memref<800x192xf32, #tpu.memory_space<vmem>>, vector<1x32xf32>
    %c784 = arith.constant 784 : index
    %c0_9 = arith.constant 0 : index
    %7 = vector.load %arg1[%c784, %c0_9] : memref<800x192xf32, #tpu.memory_space<vmem>>, vector<1x32xf32>
    %c792 = arith.constant 792 : index
    %c0_10 = arith.constant 0 : index
    %8 = vector.load %arg1[%c792, %c0_10] : memref<800x192xf32, #tpu.memory_space<vmem>>, vector<1x1xf32>
    %9 = vector.extract_strided_slice %0 {offsets = [0, 0, 0], sizes = [1, 7, 18], strides = [1, 1, 1]} : vector<2x8x72xf32> to vector<1x7x18xf32>
    %10 = vector.shape_cast %9 : vector<1x7x18xf32> to vector<7x18xf32>
    %11 = vector.extract_strided_slice %0 {offsets = [0, 0, 18], sizes = [1, 7, 18], strides = [1, 1, 1]} : vector<2x8x72xf32> to vector<1x7x18xf32>
    %12 = vector.shape_cast %11 : vector<1x7x18xf32> to vector<7x18xf32>
    %13 = vector.extract_strided_slice %0 {offsets = [0, 0, 36], sizes = [1, 7, 18], strides = [1, 1, 1]} : vector<2x8x72xf32> to vector<1x7x18xf32>
    %14 = vector.shape_cast %13 : vector<1x7x18xf32> to vector<7x18xf32>
    %15 = vector.extract_strided_slice %0 {offsets = [0, 0, 54], sizes = [1, 7, 18], strides = [1, 1, 1]} : vector<2x8x72xf32> to vector<1x7x18xf32>
    %16 = vector.shape_cast %15 : vector<1x7x18xf32> to vector<7x18xf32>
    %17 = vector.extract_strided_slice %0 {offsets = [0, 1, 0], sizes = [1, 7, 18], strides = [1, 1, 1]} : vector<2x8x72xf32> to vector<1x7x18xf32>
    %18 = vector.shape_cast %17 : vector<1x7x18xf32> to vector<7x18xf32>
    %19 = vector.extract_strided_slice %0 {offsets = [0, 0, 36], sizes = [1, 7, 18], strides = [1, 1, 1]} : vector<2x8x72xf32> to vector<1x7x18xf32>
    %20 = vector.shape_cast %19 : vector<1x7x18xf32> to vector<7x18xf32>
    %21 = vector.extract_strided_slice %0 {offsets = [0, 0, 54], sizes = [1, 7, 18], strides = [1, 1, 1]} : vector<2x8x72xf32> to vector<1x7x18xf32>
    %22 = vector.shape_cast %21 : vector<1x7x18xf32> to vector<7x18xf32>
    %23 = vector.extract_strided_slice %0 {offsets = [0, 1, 0], sizes = [1, 7, 18], strides = [1, 1, 1]} : vector<2x8x72xf32> to vector<1x7x18xf32>
    %24 = vector.shape_cast %23 : vector<1x7x18xf32> to vector<7x18xf32>
    %25 = vector.extract_strided_slice %0 {offsets = [0, 1, 18], sizes = [1, 7, 18], strides = [1, 1, 1]} : vector<2x8x72xf32> to vector<1x7x18xf32>
    %26 = vector.shape_cast %25 : vector<1x7x18xf32> to vector<7x18xf32>
    %27 = vector.extract_strided_slice %0 {offsets = [0, 1, 36], sizes = [1, 7, 18], strides = [1, 1, 1]} : vector<2x8x72xf32> to vector<1x7x18xf32>
    %28 = vector.shape_cast %27 : vector<1x7x18xf32> to vector<7x18xf32>
    %29 = tpu.concatenate %10, %12, %14, %16, %18, %20, %22, %24, %26, %28 in 1 : vector<7x18xf32>, vector<7x18xf32>, vector<7x18xf32>, vector<7x18xf32>, vector<7x18xf32>, vector<7x18xf32>, vector<7x18xf32>, vector<7x18xf32>, vector<7x18xf32>, vector<7x18xf32> -> vector<7x180xf32>
    %30 = vector.extract_strided_slice %0 {offsets = [1, 0, 0], sizes = [1, 7, 18], strides = [1, 1, 1]} : vector<2x8x72xf32> to vector<1x7x18xf32>
    %31 = vector.shape_cast %30 : vector<1x7x18xf32> to vector<7x18xf32>
    %32 = vector.extract_strided_slice %0 {offsets = [1, 0, 18], sizes = [1, 7, 18], strides = [1, 1, 1]} : vector<2x8x72xf32> to vector<1x7x18xf32>
    %33 = vector.shape_cast %32 : vector<1x7x18xf32> to vector<7x18xf32>
    %34 = vector.extract_strided_slice %0 {offsets = [1, 0, 36], sizes = [1, 7, 18], strides = [1, 1, 1]} : vector<2x8x72xf32> to vector<1x7x18xf32>
    %35 = vector.shape_cast %34 : vector<1x7x18xf32> to vector<7x18xf32>
    %36 = vector.extract_strided_slice %0 {offsets = [1, 0, 54], sizes = [1, 7, 18], strides = [1, 1, 1]} : vector<2x8x72xf32> to vector<1x7x18xf32>
    %37 = vector.shape_cast %36 : vector<1x7x18xf32> to vector<7x18xf32>
    %38 = vector.extract_strided_slice %0 {offsets = [1, 1, 0], sizes = [1, 7, 18], strides = [1, 1, 1]} : vector<2x8x72xf32> to vector<1x7x18xf32>
    %39 = vector.shape_cast %38 : vector<1x7x18xf32> to vector<7x18xf32>
    %40 = vector.extract_strided_slice %0 {offsets = [1, 0, 36], sizes = [1, 7, 18], strides = [1, 1, 1]} : vector<2x8x72xf32> to vector<1x7x18xf32>
    %41 = vector.shape_cast %40 : vector<1x7x18xf32> to vector<7x18xf32>
    %42 = vector.extract_strided_slice %0 {offsets = [1, 0, 54], sizes = [1, 7, 18], strides = [1, 1, 1]} : vector<2x8x72xf32> to vector<1x7x18xf32>
    %43 = vector.shape_cast %42 : vector<1x7x18xf32> to vector<7x18xf32>
    %44 = vector.extract_strided_slice %0 {offsets = [1, 1, 0], sizes = [1, 7, 18], strides = [1, 1, 1]} : vector<2x8x72xf32> to vector<1x7x18xf32>
    %45 = vector.shape_cast %44 : vector<1x7x18xf32> to vector<7x18xf32>
    %46 = vector.extract_strided_slice %0 {offsets = [1, 1, 18], sizes = [1, 7, 18], strides = [1, 1, 1]} : vector<2x8x72xf32> to vector<1x7x18xf32>
    %47 = vector.shape_cast %46 : vector<1x7x18xf32> to vector<7x18xf32>
    %48 = vector.extract_strided_slice %0 {offsets = [1, 1, 36], sizes = [1, 7, 18], strides = [1, 1, 1]} : vector<2x8x72xf32> to vector<1x7x18xf32>
    %49 = vector.shape_cast %48 : vector<1x7x18xf32> to vector<7x18xf32>
    %50 = tpu.concatenate %31, %33, %35, %37, %39, %41, %43, %45, %47, %49 in 1 : vector<7x18xf32>, vector<7x18xf32>, vector<7x18xf32>, vector<7x18xf32>, vector<7x18xf32>, vector<7x18xf32>, vector<7x18xf32>, vector<7x18xf32>, vector<7x18xf32>, vector<7x18xf32> -> vector<7x180xf32>
    %51 = tpu.concatenate %29, %50 in 0 : vector<7x180xf32>, vector<7x180xf32> -> vector<14x180xf32>
    %cst = arith.constant dense<0.000000e+00> : vector<14x192xf32>
    %52 = tpu.matmul %51, %1, %cst {dimension_numbers = #tpu.dot_dimension_numbers<[1], [0], [0], [1], [0, 0, 1, 1], [], []>} : vector<14x180xf32>, vector<180x192xf32>, vector<14x192xf32> -> vector<14x192xf32>
    %53 = vector.broadcast %2 : vector<1x192xf32> to vector<14x192xf32>
    %54 = arith.addf %52, %53 : vector<14x192xf32>
    %cst_11 = arith.constant 0.000000e+00 : f32
    %55 = vector.broadcast %cst_11 : f32 to vector<14x192xf32>
    %56 = arith.maximumf %54, %55 : vector<14x192xf32>
    %57 = vector.extract_strided_slice %56 {offsets = [0, 0], sizes = [5, 96], strides = [1, 1]} : vector<14x192xf32> to vector<5x96xf32>
    %58 = vector.extract_strided_slice %56 {offsets = [0, 96], sizes = [5, 96], strides = [1, 1]} : vector<14x192xf32> to vector<5x96xf32>
    %59 = vector.extract_strided_slice %56 {offsets = [1, 0], sizes = [5, 96], strides = [1, 1]} : vector<14x192xf32> to vector<5x96xf32>
    %60 = vector.extract_strided_slice %56 {offsets = [1, 96], sizes = [5, 96], strides = [1, 1]} : vector<14x192xf32> to vector<5x96xf32>
    %61 = vector.extract_strided_slice %56 {offsets = [2, 0], sizes = [5, 96], strides = [1, 1]} : vector<14x192xf32> to vector<5x96xf32>
    %62 = tpu.concatenate %57, %58, %59, %60, %61 in 1 : vector<5x96xf32>, vector<5x96xf32>, vector<5x96xf32>, vector<5x96xf32>, vector<5x96xf32> -> vector<5x480xf32>
    %63 = vector.extract_strided_slice %56 {offsets = [7, 0], sizes = [5, 96], strides = [1, 1]} : vector<14x192xf32> to vector<5x96xf32>
    %64 = vector.extract_strided_slice %56 {offsets = [7, 96], sizes = [5, 96], strides = [1, 1]} : vector<14x192xf32> to vector<5x96xf32>
    %65 = vector.extract_strided_slice %56 {offsets = [8, 0], sizes = [5, 96], strides = [1, 1]} : vector<14x192xf32> to vector<5x96xf32>
    %66 = vector.extract_strided_slice %56 {offsets = [8, 96], sizes = [5, 96], strides = [1, 1]} : vector<14x192xf32> to vector<5x96xf32>
    %67 = vector.extract_strided_slice %56 {offsets = [9, 0], sizes = [5, 96], strides = [1, 1]} : vector<14x192xf32> to vector<5x96xf32>
    %68 = tpu.concatenate %63, %64, %65, %66, %67 in 1 : vector<5x96xf32>, vector<5x96xf32>, vector<5x96xf32>, vector<5x96xf32>, vector<5x96xf32> -> vector<5x480xf32>
    %69 = tpu.concatenate %62, %68 in 0 : vector<5x480xf32>, vector<5x480xf32> -> vector<10x480xf32>
    %cst_12 = arith.constant dense<0.000000e+00> : vector<10x96xf32>
    %70 = tpu.matmul %69, %3, %cst_12 {dimension_numbers = #tpu.dot_dimension_numbers<[1], [0], [0], [1], [0, 0, 1, 1], [], []>} : vector<10x480xf32>, vector<480x96xf32>, vector<10x96xf32> -> vector<10x96xf32>
    %71 = vector.broadcast %4 : vector<1x96xf32> to vector<10x96xf32>
    %72 = arith.addf %70, %71 : vector<10x96xf32>
    %cst_13 = arith.constant 0.000000e+00 : f32
    %73 = vector.broadcast %cst_13 : f32 to vector<10x96xf32>
    %74 = arith.maximumf %72, %73 : vector<10x96xf32>
    %75 = vector.extract_strided_slice %74 {offsets = [0, 0], sizes = [5, 96], strides = [1, 1]} : vector<10x96xf32> to vector<5x96xf32>
    %cst_14 = arith.constant dense<0.000000e+00> : vector<96xf32>
    %76 = vector.multi_reduction <add>, %75, %cst_14 [0] : vector<5x96xf32> to vector<96xf32>
    %77 = vector.shape_cast %76 : vector<96xf32> to vector<1x96xf32>
    %cst_15 = arith.constant 5.000000e+00 : f32
    %78 = vector.broadcast %cst_15 : f32 to vector<1x96xf32>
    %79 = arith.divf %77, %78 : vector<1x96xf32>
    %80 = vector.extract_strided_slice %74 {offsets = [5, 0], sizes = [5, 96], strides = [1, 1]} : vector<10x96xf32> to vector<5x96xf32>
    %cst_16 = arith.constant dense<0.000000e+00> : vector<96xf32>
    %81 = vector.multi_reduction <add>, %80, %cst_16 [0] : vector<5x96xf32> to vector<96xf32>
    %82 = vector.shape_cast %81 : vector<96xf32> to vector<1x96xf32>
    %cst_17 = arith.constant 5.000000e+00 : f32
    %83 = vector.broadcast %cst_17 : f32 to vector<1x96xf32>
    %84 = arith.divf %82, %83 : vector<1x96xf32>
    %85 = tpu.concatenate %79, %84 in 0 : vector<1x96xf32>, vector<1x96xf32> -> vector<2x96xf32>
    %cst_18 = arith.constant dense<0.000000e+00> : vector<2x32xf32>
    %86 = tpu.matmul %85, %5, %cst_18 {dimension_numbers = #tpu.dot_dimension_numbers<[1], [0], [0], [1], [0, 0, 1, 1], [], []>} : vector<2x96xf32>, vector<96x32xf32>, vector<2x32xf32> -> vector<2x32xf32>
    %87 = vector.broadcast %6 : vector<1x32xf32> to vector<2x32xf32>
    %88 = arith.addf %86, %87 : vector<2x32xf32>
    %cst_19 = arith.constant 0.000000e+00 : f32
    %89 = vector.broadcast %cst_19 : f32 to vector<2x32xf32>
    %90 = arith.maximumf %88, %89 : vector<2x32xf32>
    %91 = vector.broadcast %7 : vector<1x32xf32> to vector<2x32xf32>
    %92 = arith.mulf %90, %91 : vector<2x32xf32>
    %cst_20 = arith.constant dense<0.000000e+00> : vector<2xf32>
    %93 = vector.multi_reduction <add>, %92, %cst_20 [1] : vector<2x32xf32> to vector<2xf32>
    %94 = vector.shape_cast %93 : vector<2xf32> to vector<2x1xf32>
    %95 = vector.broadcast %8 : vector<1x1xf32> to vector<2x1xf32>
    %96 = arith.addf %94, %95 : vector<2x1xf32>
    %c0_21 = arith.constant 0 : index
    %c0_22 = arith.constant 0 : index
    %97 = vector.load %arg2[%c0_21, %c0_22] : memref<2x1xf32, #tpu.memory_space<vmem>>, vector<2x1xf32>
    tpu.vector_store %arg2[%c0_21, %c0_22], %96 {strides = array<i32>} : memref<2x1xf32, #tpu.memory_space<vmem>>, vector<2x1xf32>,
    return
  }
}

</mosaic_0001>

<bundles_post_ra>
// kernel: tpu_custom_call.1
= control target key start
LH: loop header
LB: loop body
LE: loop exit
PB: predicated region body
PF: predicated region fallthrough
CT: control target
= control target key end

     0   :  { %s717_s22 = smov 126   ;;  %s718_s27 = smov 72   ;;  %vm200_vm0 = vcmask 1043456   ;;  %vm180_vm1 = vcmask 1046528   ;;  %vm194_vm2 = vcmask 424960   ;;  %vm148_vm3 = vcmask 588800   ;;  %s1207_s0 = inlined_call_operand.vmem [shape: f32[2,8,72], index: 0, kind: input, shape index: {}]   ;;  %s1208_s1 = inlined_call_operand.vmem [shape: f32[800,192], index: 1, kind: input, shape index: {}]   ;;  %s1209_s2 = inlined_call_operand.vmem [shape: f32[2,1], index: 2, kind: output, shape index: {}]  }
   0x1   :  { %v741_v0 = vld [vmem:[%s1207_s0] sm:$0xff]  ;;  %v746_v1 = vld [vmem:[%s1207_s0 + $0x8] sm:$0xff]  ;;  %v44_v2 = vld [vmem:[%s1208_s1 + $0xf8] sm:$0xff]  ;;  %s719_s8 = smov 54   ;;  %vm150_vm4 = vcmask 736256   ;;  %vm152_vm5 = vcmask 883712  }
   0x2   :  { %v138_v3 = vrot.slane %v741_v0, 1  ;;  %v159_v4 = vrot.slane %v746_v1, 1  ;;  %207 = vmatprep.subr.mxu0 %v44_v2  ;;  %v43_v5 = vld [vmem:[%s1208_s1 + $0xf0] sm:$0xff]  ;;  %v42_v6 = vld [vmem:[%s1208_s1 + $0xe8] sm:$0xff]  ;;  %v41_v7 = vld [vmem:[%s1208_s1 + $0xe0] sm:$0xff]  ;;  %v712_v12 = vpack.i.bf16 %v741_v0, %v746_v1  ;;  %vm154_vm6 = vcmask 1031168  }
   0x3   :  { %208 = vmatpush1.msra.mxu0 %v43_v5  ;;  %v40_v8 = vld [vmem:[%s1208_s1 + $0xd8] sm:$0xff]  ;;  %v39_v10 = vld [vmem:[%s1208_s1 + $0xd0] sm:$0xff]  ;;  %v38_v11 = vld [vmem:[%s1208_s1 + $0xc8] sm:$0xff]  ;;  %s721_s28 = smov 64   ;;  %vm323_vm7 = vcmask 1045504   ;;  %vm339_vm8 = vcmask 1044480  }
   0x4   :  { %v707_v9 = vpack.i.bf16 %v138_v3, %v159_v4  ;;  %166 = vrot.lane.b32.xlu1 %v159_v4, %s717_s22  ;;  %209 = vmatprep.subr.mxu0 %v42_v6  ;;  %v37_v13 = vld [vmem:[%s1208_s1 + $0xc0] sm:$0xff]  ;;  %v36_v14 = vld [vmem:[%s1208_s1 + $0xb8] sm:$0xff]  ;;  %v35_v15 = vld [vmem:[%s1208_s1 + $0xb0] sm:$0xff]  ;;  %vm297_vm9 = vcmask 523264   ;;  %vm344_vm10 = vcmask 785408   ;;  %vm303_vm11 = vcmask 261120  }
   0x5   :  { %210 = vmatpush1.msra.mxu0 %v41_v7  ;;  %v34_v16 = vld [vmem:[%s1208_s1 + $0xa8] sm:$0xff]  ;;  %v33_v17 = vld [vmem:[%s1208_s1 + $0xa0] sm:$0xff]  ;;  %v32_v18 = vld [vmem:[%s1208_s1 + $0x98] sm:$0xff]  ;;  %vm722_vm12 = vmmov 0   ;;  %vm502_vm13 = vcmask 782336   ;;  %vm514_vm14 = vcmask 1042432  }
   0x6   :  { %708 = vrot.lane.b32.xlu0 %v707_v9, %s718_s27  ;;  %211 = vmatprep.subr.mxu0 %v40_v8  ;;  %v31_v19 = vld [vmem:[%s1208_s1 + $0x90] sm:$0xff]  ;;  %v30_v20 = vld [vmem:[%s1208_s1 + $0x88] sm:$0xff]  ;;  %v29_v21 = vld [vmem:[%s1208_s1 + $0x80] sm:$0xff]  ;;  %vm527_vm15 = vcmask 1040384  }
   0x7   :  { %212 = vmatpush1.msra.mxu0 %v39_v10  ;;  %v28_v22 = vld [vmem:[%s1208_s1 + $0x78] sm:$0xff]  ;;  %v27_v23 = vld [vmem:[%s1208_s1 + $0x70] sm:$0xff]  ;;  %v26_v24 = vld [vmem:[%s1208_s1 + $0x68] sm:$0xff] }
   0x8   :  { %145 = vrot.lane.b32.xlu1 %v138_v3, %s717_s22  ;;  %213 = vmatprep.subr.mxu0 %v38_v11  ;;  %v25_v25 = vld [vmem:[%s1208_s1 + $0x60] sm:$0xff]  ;;  %v24_v26 = vld [vmem:[%s1208_s1 + $0x58] sm:$0xff]  ;;  %v23_v27 = vld [vmem:[%s1208_s1 + $0x50] sm:$0xff] }
   0x9   :  { %214 = vmatpush1.msra.mxu0 %v37_v13  ;;  %v22_v28 = vld [vmem:[%s1208_s1 + $0x48] sm:$0xff]  ;;  %v21_v29 = vld [vmem:[%s1208_s1 + $0x40] sm:$0xff]  ;;  %v20_v30 = vld [vmem:[%s1208_s1 + $0x38] sm:$0xff] }
   0xa   :  { %713 = vrot.lane.b32.xlu0 %v712_v12, %s719_s8  ;;  %215 = vmatprep.subr.mxu0 %v36_v14  ;;  %v19_v31 = vld [vmem:[%s1208_s1 + $0x30] sm:$0xff]  ;;  %v18_v32 = vld [vmem:[%s1208_s1 + $0x28] sm:$0xff]  ;;  %v17_v33 = vld [vmem:[%s1208_s1 + $0x20] sm:$0xff] }
   0xb   :  { %216 = vmatpush1.msra.mxu0 %v35_v15  ;;  %v16_v34 = vld [vmem:[%s1208_s1 + $0x18] sm:$0xff]  ;;  %v15_v35 = vld [vmem:[%s1208_s1 + $0x10] sm:$0xff]  ;;  %v14_v36 = vld [vmem:[%s1208_s1 + $0x8] sm:$0xff] }
   0xc   :  { %217 = vmatprep.subr.mxu0 %v34_v16  ;;  %v13_v37 = vld [vmem:[%s1208_s1] sm:$0xff]  ;;  %v58_v38 = vld [vmem:[%s1208_s1 + $0x168] sm:$0xf]  ;;  %v56_v40 = vld [vmem:[%s1208_s1 + $0x158] sm:$0xff] }
   0xd   :  { %218 = vmatpush1.msra.mxu0 %v33_v17  ;;  %v57_v39 = vld [vmem:[%s1208_s1 + $0x160] sm:$0xf]  ;;  %v55_v41 = vld [vmem:[%s1208_s1 + $0x150] sm:$0xff]  ;;  %v54_v42 = vld [vmem:[%s1208_s1 + $0x148] sm:$0xff] }
   0xe   :  { %219 = vmatprep.subr.mxu0 %v32_v18  ;;  %v53_v43 = vld [vmem:[%s1208_s1 + $0x140] sm:$0xff]  ;;  %v52_v44 = vld [vmem:[%s1208_s1 + $0x138] sm:$0xff]  ;;  %v51_v45 = vld [vmem:[%s1208_s1 + $0x130] sm:$0xff] }
   0xf   :  { %220 = vmatpush1.msra.mxu0 %v31_v19  ;;  %v50_v46 = vld [vmem:[%s1208_s1 + $0x128] sm:$0xff]  ;;  %v49_v47 = vld [vmem:[%s1208_s1 + $0x120] sm:$0xff]  ;;  %v48_v48 = vld [vmem:[%s1208_s1 + $0x118] sm:$0xff] }
  0x10   :  { %221 = vmatprep.subr.mxu0 %v30_v20  ;;  %v47_v49 = vld [vmem:[%s1208_s1 + $0x110] sm:$0xff]  ;;  %v46_v50 = vld [vmem:[%s1208_s1 + $0x108] sm:$0xff]  ;;  %v45_v51 = vld [vmem:[%s1208_s1 + $0x100] sm:$0xff] }
  0x11   :  { %222 = vmatpush1.msra.mxu0 %v29_v21  ;;  %v91_v10 = vld [vmem:[%s1208_s1 + $0x360] sm:$0xff]  ;;  %v90_v12 = vld [vmem:[%s1208_s1 + $0x350] sm:$0xff] }
  0x12   :  { %223 = vmatprep.subr.mxu0 %v28_v22  ;;  %v75_v11 = vld [vmem:[%s1208_s1 + $0x260] sm:$0xff]  ;;  %v74_v13 = vld [vmem:[%s1208_s1 + $0x250] sm:$0xff] }
  0x13   :  { %224 = vmatpush1.msra.mxu0 %v27_v23  ;;  %v89_v14 = vld [vmem:[%s1208_s1 + $0x340] sm:$0xff]  ;;  %v88_v16 = vld [vmem:[%s1208_s1 + $0x330] sm:$0xff] }
  0x14   :  { %225 = vmatprep.subr.mxu0 %v26_v24  ;;  %v73_v15 = vld [vmem:[%s1208_s1 + $0x240] sm:$0xff]  ;;  %v72_v17 = vld [vmem:[%s1208_s1 + $0x230] sm:$0xff] }
  0x15   :  { %226 = vmatpush1.msra.mxu0 %v25_v25  ;;  %v87_v18 = vld [vmem:[%s1208_s1 + $0x320] sm:$0xff]  ;;  %v86_v20 = vld [vmem:[%s1208_s1 + $0x310] sm:$0xff] }
  0x16   :  { %227 = vmatprep.subr.mxu0 %v24_v26  ;;  %v71_v19 = vld [vmem:[%s1208_s1 + $0x220] sm:$0xff]  ;;  %v70_v21 = vld [vmem:[%s1208_s1 + $0x210] sm:$0xff] }
  0x17   :  { %228 = vmatpush1.msra.mxu0 %v23_v27  ;;  %v85_v22 = vld [vmem:[%s1208_s1 + $0x300] sm:$0xff]  ;;  %v84_v24 = vld [vmem:[%s1208_s1 + $0x2f0] sm:$0xff] }
  0x18   :  { %229 = vmatprep.subr.mxu0 %v22_v28  ;;  %v69_v23 = vld [vmem:[%s1208_s1 + $0x200] sm:$0xff]  ;;  %v68_v25 = vld [vmem:[%s1208_s1 + $0x1f0] sm:$0xff] }
  0x19   :  { %230 = vmatpush1.msra.mxu0 %v21_v29  ;;  %v83_v26 = vld [vmem:[%s1208_s1 + $0x2e0] sm:$0xff]  ;;  %v82_v28 = vld [vmem:[%s1208_s1 + $0x2d0] sm:$0xff] }
  0x1a   :  { %231 = vmatprep.subr.mxu0 %v20_v30  ;;  %v67_v27 = vld [vmem:[%s1208_s1 + $0x1e0] sm:$0xff]  ;;  %v66_v29 = vld [vmem:[%s1208_s1 + $0x1d0] sm:$0xff] }
  0x1b   :  { %232 = vmatpush1.msra.mxu0 %v19_v31  ;;  %v81_v30 = vld [vmem:[%s1208_s1 + $0x2c0] sm:$0xff]  ;;  %v184_v31 = vlaneseq }
  0x1c   :  { %233 = vmatprep.subr.mxu0 %v18_v32 }
  0x1d   :  { %234 = vmatpush1.msra.mxu0 %v17_v33  ;;  %v185_v32 = vshrl.u32 %v184_v31, 7  ;;  %v120_v31 = vld [vmem:[%s1208_s1 + $0x530] sm:$0xff] }
  0x1e   :  { %235 = vmatprep.subr.mxu0 %v16_v34  ;;  %v65_v34 = vld [vmem:[%s1208_s1 + $0x1c0] sm:$0xff] }
  0x1f   :  { %236 = vmatpush1.msra.mxu0 %v15_v35  ;;  %v186_v33 = vsub.s32 0, %v185_v32  ;;  %v80_v35 = vld [vmem:[%s1208_s1 + $0x2b0] sm:$0xff] }
  0x20   :  { %237 = vmatprep.subr.mxu0 %v14_v36  ;;  %v64_v36 = vld [vmem:[%s1208_s1 + $0x1b0] sm:$0xff] }
  0x21   :  { %238 = vmatpush1.msra.mxu0 %v13_v37  ;;  %v615_v37 = vld [vmem:[%s1208_s1 + $0x170] ss:$8 sm:$0x3] }
  0x22   :  { %616 = vmatprep.subr.msk.mxu0 %vm200_vm0, %v58_v38  ;;  %v79_v38 = vld [vmem:[%s1208_s1 + $0x2a0] sm:$0xff] }
  0x23   :  { %617 = vmatpush2.msk.msra.mxu0 %vm200_vm0, %v57_v39  ;;  %v190_v39 = vsub.s32 1, %v185_v32  ;;  %v119_v32 = vld [vmem:[%s1208_s1 + $0x520] sm:$0xff]  ;;  %vm604_vm0 = vcmask 254976  }
  0x24   :  { %259 = vmatprep.subr.mxu0 %v56_v40  ;;  %v187_v40 = vrot.slane %v615_v37, %v186_v33  ;;  %v118_v33 = vld [vmem:[%s1208_s1 + $0x510] sm:$0xff] }
  0x25   :  { %260 = vmatpush2.msra.mxu0 %v55_v41  ;;  %v63_v41 = vld [vmem:[%s1208_s1 + $0x1a0] sm:$0xff] }
  0x26   :  { %261 = vmatprep.subr.mxu0 %v54_v42  ;;  %v78_v42 = vld [vmem:[%s1208_s1 + $0x290] sm:$0xff] }
  0x27   :  { %262 = vmatpush2.msra.mxu0 %v53_v43  ;;  %v191_v43 = vrot.slane %v615_v37, %v190_v39  ;;  %v113_v39 = vld [vmem:[%s1208_s1 + $0x4c0] sm:$0xff] }
  0x28   :  { %263 = vmatprep.subr.mxu0 %v52_v44  ;;  %v62_v44 = vld [vmem:[%s1208_s1 + $0x190] sm:$0xff] }
  0x29   :  { %264 = vmatpush2.msra.mxu0 %v51_v45  ;;  %v77_v45 = vld [vmem:[%s1208_s1 + $0x280] sm:$0xff] }
  0x2a   :  { %265 = vmatprep.subr.mxu0 %v50_v46 }
  0x2b   :  { %266 = vmatpush2.msra.mxu0 %v49_v47 }
  0x2c   :  { %267 = vmatprep.subr.mxu0 %v48_v48  ;;  %v61_v48 = vld [vmem:[%s1208_s1 + $0x180] sm:$0xff] }
  0x2d   :  { %268 = vmatpush2.msra.mxu0 %v47_v49 }
  0x2e   :  { %269 = vmatprep.subr.mxu0 %v46_v50 }
  0x2f   :  { %270 = vmatpush2.msra.mxu0 %v45_v51 }
  0x76   :  { %v167_v52 = vpop.permute.xlu1 %166 }
  0x77   :  { %v177_v53 = vrot.slane %v167_v52, 1 }
  0x78   :  { %v709_v54 = vpop.permute.xlu0 %708 }
  0x79   :  { %v711_v55 = vunpack.i.h.bf16 %v709_v54  ;;  %v710_v56 = vunpack.i.l.bf16 %v709_v54 }
  0x7a   :  { %v146_v57 = vpop.permute.xlu1 %145 }
  0x7b   :  { %v182_v58 = vsel %vm180_vm1, %v146_v57, %v177_v53  ;;  %v149_v62 = vsel %vm148_vm3, %v741_v0, %v711_v55  ;;  %v169_v63 = vsel %vm148_vm3, %v746_v1, %v710_v56  ;;  %v92_v0 = vld [vmem:[%s1208_s1 + $0x370] sm:$0xff] }
  0x7c   :  { %v714_v59 = vpop.permute.xlu0 %713  ;;  %618 = vmatprep.mubr.msk.f32.mxu0 %vm194_vm2, %v182_v58  ;;  %v76_v1 = vld [vmem:[%s1208_s1 + $0x270] sm:$0xff]  ;;  %623 = vmatprep.subr.mxu1 %v92_v0 }
  0x7d   :  { %v716_v60 = vunpack.i.h.bf16 %v714_v59  ;;  %v715_v61 = vunpack.i.l.bf16 %v714_v59  ;;  %624 = vmatpush3.msra.mxu1 %v76_v1 }
  0x7e   :  { %625 = vmatprep.subr.mxu1 %v91_v10 }
  0x7f   :  { %v170_v2 = vsel %vm150_vm4, %v169_v63, %v715_v61  ;;  %v151_v3 = vsel %vm150_vm4, %v149_v62, %v716_v60  ;;  %626 = vmatpush3.msra.mxu1 %v75_v11 }
  0x80   :  { %v171_v4 = vsel %vm152_vm5, %v170_v2, %v715_v61  ;;  %v153_v5 = vsel %vm152_vm5, %v151_v3, %v716_v60  ;;  %627 = vmatprep.subr.mxu1 %v90_v12 }
  0x81   :  { %v172_v6 = vsel %vm154_vm6, %v171_v4, %v167_v52  ;;  %v155_v8 = vsel %vm154_vm6, %v153_v5, %v146_v57  ;;  %628 = vmatpush3.msra.mxu1 %v74_v13  ;;  %v720_v52 = vmov 0.0  }
  0x82   :  { %v176_v7 = vrot.slane %v172_v6, 1  ;;  %629 = vmatprep.subr.mxu1 %v89_v14  ;;  %674 = vmatprep.subr.mxu0 %v720_v52 }
  0x83   :  { %630 = vmatpush3.msra.mxu1 %v73_v15  ;;  %v108_v15 = vld [vmem:[%s1208_s1 + $0x470] sm:$0xff] }
  0x84   :  { %v181_v9 = vsel %vm180_vm1, %v155_v8, %v176_v7  ;;  %631 = vmatprep.subr.mxu1 %v88_v16  ;;  %v107_v16 = vld [vmem:[%s1208_s1 + $0x460] sm:$0xff]  ;;  %vm609_vm1 = vcmask 1024  }
  0x85   :  { %272 = vmatmul.mubr.f32.vlgmr.msra.gmra.mxu0 %v181_v9  ;;  %632 = vmatpush3.msra.mxu1 %v72_v17  ;;  %v106_v17 = vld [vmem:[%s1208_s1 + $0x450] sm:$0xff] }
  0x86   :  { %619 = vmatprep.mubr.msk.f32.mxu0 %vm194_vm2, %v177_v53  ;;  %633 = vmatprep.subr.mxu1 %v87_v18  ;;  %v105_v18 = vld [vmem:[%s1208_s1 + $0x440] sm:$0xff] }
  0x87   :  { %634 = vmatpush3.msra.mxu1 %v71_v19  ;;  %v104_v19 = vld [vmem:[%s1208_s1 + $0x430] sm:$0xff] }
  0x88   :  { %635 = vmatprep.subr.mxu1 %v86_v20  ;;  %v103_v20 = vld [vmem:[%s1208_s1 + $0x420] sm:$0xff] }
  0x89   :  { %278 = vmatmul.mubr.f32.gmra.mxu0 %v176_v7  ;;  %636 = vmatpush3.msra.mxu1 %v70_v21  ;;  %v102_v21 = vld [vmem:[%s1208_s1 + $0x410] sm:$0xff] }
  0x8a   :  { %637 = vmatprep.subr.mxu1 %v85_v22  ;;  %v101_v22 = vld [vmem:[%s1208_s1 + $0x400] sm:$0xff]  ;;  %698 = vmatprep.mubr.msk.f32.mxu0 %vm722_vm12, %v720_v52 }
  0x8b   :  { %638 = vmatpush3.msra.mxu1 %v69_v23  ;;  %v100_v23 = vld [vmem:[%s1208_s1 + $0x3f0] sm:$0xff] }
  0x8c   :  { %639 = vmatprep.subr.mxu1 %v84_v24  ;;  %v99_v24 = vld [vmem:[%s1208_s1 + $0x3e0] sm:$0xff] }
  0x8d   :  { %640 = vmatpush3.msra.mxu1 %v68_v25  ;;  %v98_v25 = vld [vmem:[%s1208_s1 + $0x3d0] sm:$0xff] }
  0x8e   :  { %641 = vmatprep.subr.mxu1 %v83_v26  ;;  %v97_v26 = vld [vmem:[%s1208_s1 + $0x3c0] sm:$0xff] }
  0x8f   :  { %642 = vmatpush3.msra.mxu1 %v67_v27  ;;  %v96_v27 = vld [vmem:[%s1208_s1 + $0x3b0] sm:$0xff] }
  0x90   :  { %643 = vmatprep.subr.mxu1 %v82_v28  ;;  %v95_v28 = vld [vmem:[%s1208_s1 + $0x3a0] sm:$0xff] }
  0x91   :  { %644 = vmatpush3.msra.mxu1 %v66_v29  ;;  %v94_v29 = vld [vmem:[%s1208_s1 + $0x390] sm:$0xff] }
  0x92   :  { %645 = vmatprep.subr.mxu1 %v81_v30  ;;  %v93_v30 = vld [vmem:[%s1208_s1 + $0x380] sm:$0xff] }
  0x93   :  { %646 = vmatpush3.msra.mxu1 %v65_v34  ;;  %v117_v34 = vld [vmem:[%s1208_s1 + $0x500] sm:$0xff] }
  0x94   :  { %647 = vmatprep.subr.mxu1 %v80_v35  ;;  %v116_v35 = vld [vmem:[%s1208_s1 + $0x4f0] sm:$0xff] }
  0x95   :  { %648 = vmatpush3.msra.mxu1 %v64_v36  ;;  %v115_v36 = vld [vmem:[%s1208_s1 + $0x4e0] sm:$0xff] }
  0x96   :  { %649 = vmatprep.subr.mxu1 %v79_v38  ;;  %v114_v38 = vld [vmem:[%s1208_s1 + $0x4d0] sm:$0xff] }
  0x97   :  { %650 = vmatpush3.msra.mxu1 %v63_v41  ;;  %v112_v41 = vld [vmem:[%s1208_s1 + $0x4b0] sm:$0xff] }
  0x98   :  { %651 = vmatprep.subr.mxu1 %v78_v42 }
  0x99   :  { %652 = vmatpush3.msra.mxu1 %v62_v44  ;;  %v111_v44 = vld [vmem:[%s1208_s1 + $0x4a0] sm:$0xff] }
  0x9a   :  { %653 = vmatprep.subr.mxu1 %v77_v45  ;;  %v110_v45 = vld [vmem:[%s1208_s1 + $0x490] sm:$0xff] }
  0x9b   :  { %654 = vmatpush3.msra.mxu1 %v61_v48  ;;  %v109_v48 = vld [vmem:[%s1208_s1 + $0x480] sm:$0xff] }
  0x9c   :  { %425 = vmatprep.subr.mxu1 %v720_v52 }
 0x145   :  { %v273_v46 = vpop.f32.mrf.mxu0 }
 0x146   :  { %v274_v47 = vadd.f32 %v273_v46, %v187_v40 }
 0x147   :  { %v275_v49 = vpop.f32.mrf.mxu0 }
 0x148   :  { %v284_v50 = vmax.f32 %v274_v47, 0.0  ;;  %v276_v51 = vadd.f32 %v275_v49, %v191_v43 }
 0x149   :  { %v279_v53 = vpop.f32.mrf.mxu0 }
 0x14a   :  { %v285_v54 = vmax.f32 %v276_v51, 0.0  ;;  %v280_v55 = vadd.f32 %v279_v53, %v187_v40  ;;  %v289_v56 = vrot.slane %v284_v50, 1  ;;  %v300_v60 = vrot.slane %v284_v50, 2  ;;  %v133_v51 = vld [vmem:[%s1208_s1 + $0x600] sm:$0xff]  ;;  %v132_v53 = vld [vmem:[%s1208_s1 + $0x5f0] sm:$0xff] }
 0x14b   :  { %v281_v57 = vpop.f32.mrf.mxu0  ;;  %675 = vmatpush3.msra.mxu0 %v133_v51 }
 0x14c   :  { %v286_v58 = vmax.f32 %v280_v55, 0.0  ;;  %v282_v59 = vadd.f32 %v281_v57, %v191_v43  ;;  %290 = vrot.lane.b32.xlu1 %v289_v56, %s721_s28  ;;  %v294_v2 = vrot.slane %v285_v54, 1  ;;  %676 = vmatprep.subr.mxu0 %v720_v52  ;;  %v130_v55 = vld [vmem:[%s1208_s1 + $0x5d0] sm:$0xff]  ;;  %v129_v56 = vld [vmem:[%s1208_s1 + $0x5c0] sm:$0xff] }
 0x14d   :  { %677 = vmatpush3.msra.mxu0 %v132_v53  ;;  %v128_v57 = vld [vmem:[%s1208_s1 + $0x5b0] sm:$0xff] }
 0x14e   :  { %v306_v61 = vrot.slane %v286_v58, 1  ;;  %v997_v62 = vrot.slane %v286_v58, 2  ;;  %v287_v63 = vmax.f32 %v282_v59, 0.0  ;;  %678 = vmatprep.subr.mxu0 %v720_v52  ;;  %v127_v58 = vld [vmem:[%s1208_s1 + $0x5a0] sm:$0xff]  ;;  %v126_v59 = vld [vmem:[%s1208_s1 + $0x590] sm:$0xff] }
 0x150   :  { %v330_v3 = vrot.slane %v997_v62, 2  ;;  %307 = vrot.lane.b32.xlu0 %v306_v61, %s721_s28  ;;  %295 = vrot.lane.b32.xlu1 %v294_v2, %s721_s28  ;;  %v324_v4 = vsel %vm323_vm7, %v300_v60, %v997_v62  ;;  %v311_v6 = vrot.slane %v287_v63, 1  ;;  %v124_v61 = vld [vmem:[%s1208_s1 + $0x570] sm:$0xff] }
 0x151   :  { %v340_v5 = vsel %vm339_vm8, %v284_v50, %v324_v4 }
 0x152   :  { %v343_v7 = vsel %vm339_vm8, %v300_v60, %v330_v3  ;;  %v125_v60 = vld [vmem:[%s1208_s1 + $0x580] sm:$0xff] }
 0x154   :  { %312 = vrot.lane.b32.xlu0 %v311_v6, %s721_s28 }
 0x1be   :  { %v1008_v9 = vpop.permute.xlu1 %290 }
 0x1bf   :  { %v302_v12 = vsel %vm297_vm9, %v285_v54, %v1008_v9 }
 0x1c2   :  { %v1006_v8 = vpop.permute.xlu0 %307  ;;  %v296_v42 = vpop.permute.xlu1 %295 }
 0x1c3   :  { %v317_v0 = vsel %vm297_vm9, %v285_v54, %v1006_v8  ;;  %v318_v1 = vsel %vm297_vm9, %v287_v63, %v1006_v8  ;;  %v298_v46 = vsel %vm297_vm9, %v1008_v9, %v296_v42  ;;  %v131_v54 = vld [vmem:[%s1208_s1 + $0x5e0] sm:$0xff]  ;;  %v122_v63 = vld [vmem:[%s1208_s1 + $0x550] sm:$0xff] }
 0x1c4   :  { %v325_v10 = vrot.slane %v317_v0, 2  ;;  %v326_v11 = vrot.slane %v318_v1, 2  ;;  %v304_v49 = vsel %vm303_vm11, %v1008_v9, %v298_v46  ;;  %679 = vmatpush3.msra.mxu0 %v131_v54 }
 0x1c5   :  { %680 = vmatprep.subr.mxu0 %v720_v52 }
 0x1c6   :  { %v327_v13 = vsel %vm323_vm7, %v325_v10, %v326_v11  ;;  %v313_v37 = vpop.permute.xlu0 %312  ;;  %681 = vmatpush3.msra.mxu0 %v130_v55 }
 0x1c7   :  { %v341_v14 = vsel %vm339_vm8, %v302_v12, %v327_v13  ;;  %v314_v40 = vsel %vm297_vm9, %v1006_v8, %v313_v37  ;;  %682 = vmatprep.subr.mxu0 %v720_v52 }
 0x1c8   :  { %414 = vmatprep.mubr.f32.mxu1 %v341_v14  ;;  %v319_v43 = vsel %vm303_vm11, %v1006_v8, %v314_v40  ;;  %683 = vmatpush3.msra.mxu0 %v129_v56  ;;  %v135_v40 = vld [vmem:[%s1208_s1 + $0x620] ss:$0 sm:$0xff] }
 0x1c9   :  { %415 = vmatmul.mubr.f32.vlgmr.msra.gmra.mxu1 %v340_v5  ;;  %v328_v47 = vrot.slane %v319_v43, 2  ;;  %684 = vmatprep.subr.mxu0 %v720_v52 }
 0x1ca   :  { %426 = vmatpush1.msra.mxu1 %v108_v15  ;;  %419 = vmatprep.mubr.f32.mxu1 %v326_v11 }
 0x1cb   :  { %427 = vmatprep.subr.mxu1 %v720_v52  ;;  %v342_v50 = vsel %vm339_vm8, %v304_v49, %v328_v47  ;;  %685 = vmatpush3.msra.mxu0 %v128_v57 }
 0x1cc   :  { %428 = vmatpush1.msra.mxu1 %v107_v16  ;;  %686 = vmatprep.subr.mxu0 %v720_v52 }
 0x1cd   :  { %429 = vmatprep.subr.mxu1 %v720_v52  ;;  %420 = vmatmul.mubr.f32.gmra.mxu1 %v997_v62  ;;  %v123_v62 = vld [vmem:[%s1208_s1 + $0x560] sm:$0xff] }
 0x1ce   :  { %430 = vmatpush1.msra.mxu1 %v106_v17  ;;  %620 = vmatprep.mubr.msk.f32.mxu1 %vm344_vm10, %v343_v7  ;;  %v121_v7 = vld [vmem:[%s1208_s1 + $0x540] ss:$0 sm:$0xff] }
 0x1cf   :  { %431 = vmatprep.subr.mxu1 %v720_v52  ;;  %687 = vmatpush3.msra.mxu0 %v127_v58 }
 0x1d0   :  { %432 = vmatpush1.msra.mxu1 %v105_v18  ;;  %688 = vmatprep.subr.mxu0 %v720_v52 }
 0x1d1   :  { %433 = vmatprep.subr.mxu1 %v720_v52  ;;  %689 = vmatpush3.msra.mxu0 %v126_v59 }
 0x1d2   :  { %434 = vmatpush1.msra.mxu1 %v104_v19  ;;  %690 = vmatprep.subr.mxu0 %v720_v52 }
 0x1d3   :  { %435 = vmatprep.subr.mxu1 %v720_v52  ;;  %691 = vmatpush3.msra.mxu0 %v125_v60 }
 0x1d4   :  { %436 = vmatpush1.msra.mxu1 %v103_v20  ;;  %692 = vmatprep.subr.mxu0 %v720_v52 }
 0x1d5   :  { %437 = vmatprep.subr.mxu1 %v720_v52  ;;  %693 = vmatpush3.msra.mxu0 %v124_v61 }
 0x1d6   :  { %438 = vmatpush1.msra.mxu1 %v102_v21  ;;  %694 = vmatprep.subr.mxu0 %v720_v52 }
 0x1d7   :  { %439 = vmatprep.subr.mxu1 %v720_v52  ;;  %695 = vmatpush3.msra.mxu0 %v123_v62 }
 0x1d8   :  { %440 = vmatpush1.msra.mxu1 %v101_v22  ;;  %696 = vmatprep.subr.mxu0 %v720_v52 }
 0x1d9   :  { %441 = vmatprep.subr.mxu1 %v720_v52  ;;  %697 = vmatpush3.msra.mxu0 %v122_v63 }
 0x1da   :  { %442 = vmatpush1.msra.mxu1 %v100_v23 }
 0x1db   :  { %443 = vmatprep.subr.mxu1 %v720_v52 }
 0x1dc   :  { %444 = vmatpush1.msra.mxu1 %v99_v24 }
 0x1dd   :  { %445 = vmatprep.subr.mxu1 %v720_v52 }
 0x1de   :  { %446 = vmatpush1.msra.mxu1 %v98_v25 }
 0x1df   :  { %447 = vmatprep.subr.mxu1 %v720_v52 }
 0x1e0   :  { %448 = vmatpush1.msra.mxu1 %v97_v26 }
 0x1e1   :  { %449 = vmatprep.subr.mxu1 %v720_v52 }
 0x1e2   :  { %450 = vmatpush1.msra.mxu1 %v96_v27 }
 0x1e3   :  { %451 = vmatprep.subr.mxu1 %v720_v52 }
 0x1e4   :  { %452 = vmatpush1.msra.mxu1 %v95_v28 }
 0x1e5   :  { %453 = vmatprep.subr.mxu1 %v720_v52 }
 0x1e6   :  { %454 = vmatpush1.msra.mxu1 %v94_v29 }
 0x1e7   :  { %455 = vmatprep.subr.mxu1 %v720_v52 }
 0x1e8   :  { %456 = vmatpush1.msra.mxu1 %v93_v30 }
 0x1e9   :  { %465 = vmatprep.subr.mxu1 %v720_v52 }
 0x1ea   :  { %466 = vmatpush2.msra.mxu1 %v120_v31 }
 0x1eb   :  { %467 = vmatprep.subr.mxu1 %v720_v52 }
 0x1ec   :  { %468 = vmatpush2.msra.mxu1 %v119_v32 }
 0x1ed   :  { %469 = vmatprep.subr.mxu1 %v720_v52 }
 0x1ee   :  { %470 = vmatpush2.msra.mxu1 %v118_v33 }
 0x1ef   :  { %471 = vmatprep.subr.mxu1 %v720_v52 }
 0x1f0   :  { %472 = vmatpush2.msra.mxu1 %v117_v34 }
 0x1f1   :  { %473 = vmatprep.subr.mxu1 %v720_v52 }
 0x1f2   :  { %474 = vmatpush2.msra.mxu1 %v116_v35 }
 0x1f3   :  { %475 = vmatprep.subr.mxu1 %v720_v52 }
 0x1f4   :  { %476 = vmatpush2.msra.mxu1 %v115_v36  ;;  %v134_v36 = vld [vmem:[%s1208_s1 + $0x610] ss:$0 sm:$0xff] }
 0x1f5   :  { %477 = vmatprep.subr.mxu1 %v720_v52 }
 0x1f6   :  { %478 = vmatpush2.msra.mxu1 %v114_v38 }
 0x1f7   :  { %479 = vmatprep.subr.mxu1 %v720_v52 }
 0x1f8   :  { %480 = vmatpush2.msra.mxu1 %v113_v39 }
 0x1f9   :  { %481 = vmatprep.subr.mxu1 %v720_v52 }
 0x1fa   :  { %482 = vmatpush2.msra.mxu1 %v112_v41 }
 0x1fb   :  { %483 = vmatprep.subr.mxu1 %v720_v52 }
 0x1fc   :  { %484 = vmatpush2.msra.mxu1 %v111_v44  ;;  %v136_v44 = vld [vmem:[%s1208_s1 + $0x630] ss:$0 sm:$0xff] }
 0x1fd   :  { %485 = vmatprep.subr.mxu1 %v720_v52 }
 0x1fe   :  { %486 = vmatpush2.msra.mxu1 %v110_v45 }
 0x1ff   :  { %487 = vmatprep.subr.mxu1 %v720_v52 }
 0x200   :  { %488 = vmatpush2.msra.mxu1 %v109_v48 }
 0x201   :  { %490 = vmatmul.mubr.f32.vlgmr.msra.gmra.mxu1 %v342_v50 }
 0x202   :  { %621 = vmatprep.mubr.msk.f32.mxu1 %vm344_vm10, %v330_v3 }
 0x205   :  { %495 = vmatmul.mubr.f32.gmra.mxu1 %v328_v47 }
 0x289   :  { %v655_v2 = vpop.f32.mrf.mxu1 }
 0x28b   :  { %v656_v3 = vpop.f32.mrf.mxu1 }
 0x28c   :  { %v657_v5 = vadd.f32 %v656_v3, %v655_v2 }
 0x28d   :  { %v658_v4 = vpop.f32.mrf.mxu1 }
 0x28e   :  { %v417_v9 = vadd.f32 %v657_v5, %v121_v7 }
 0x28f   :  { %v659_v6 = vpop.f32.mrf.mxu1 }
 0x290   :  { %v660_v8 = vadd.f32 %v659_v6, %v658_v4 }
 0x292   :  { %v422_v12 = vadd.f32 %v660_v8, %v121_v7 }
 0x2c1   :  { %v491_v0 = vpop.f32.mrf.mxu1 }
 0x2c2   :  { %v492_v1 = vadd.f32 %v491_v0, %v417_v9 }
 0x2c3   :  { %v493_v10 = vpop.f32.mrf.mxu1 }
 0x2c4   :  { %v500_v11 = vmax.f32 %v492_v1, 0.0 }
 0x2c5   :  { %v496_v13 = vpop.f32.mrf.mxu1 }
 0x2c6   :  { %v503_v52 = vsel %vm502_vm13, %v500_v11, 0.0  ;;  %v497_v14 = vadd.f32 %v496_v13, %v422_v12  ;;  %v515_v19 = vrot.slane %v500_v11, 5 }
 0x2c7   :  { %v504_v15 = vrot.slane %v503_v52, 4  ;;  %v498_v16 = vpop.f32.mrf.mxu1 }
 0x2c8   :  { %v501_v17 = vmax.f32 %v497_v14, 0.0 }
 0x2c9   :  { %v505_v18 = vadd.f32 %v504_v15, %v503_v52 }
 0x2ca   :  { %v516_v20 = vrot.slane %v501_v17, 5 }
 0x2cb   :  { %v506_v21 = vrot.slane %v505_v18, 2 }
 0x2cc   :  { %v517_v22 = vsel %vm514_vm14, %v515_v19, %v516_v20 }
 0x2cd   :  { %v519_v23 = vsel %vm502_vm13, %v517_v22, 0.0  ;;  %v507_v24 = vadd.f32 %v506_v21, %v505_v18 }
 0x2ce   :  { %v520_v25 = vrot.slane %v519_v23, 4 }
 0x2cf   :  { %v508_v27 = vrot.slane %v507_v24, 1 }
 0x2d0   :  { %v521_v26 = vadd.f32 %v520_v25, %v519_v23 }
 0x2d1   :  { %v509_v30 = vadd.f32 %v508_v27, %v507_v24 }
 0x2d2   :  { %v522_v28 = vrot.slane %v521_v26, 2 }
 0x2d3   :  { %v511_v33 = vmul.f32 0.2, %v509_v30 }
 0x2d4   :  { %v523_v29 = vadd.f32 %v522_v28, %v521_v26 }
 0x2d6   :  { %v524_v31 = vrot.slane %v523_v29, 1 }
 0x2d8   :  { %v525_v32 = vadd.f32 %v524_v31, %v523_v29 }
 0x2da   :  { %v526_v34 = vmul.f32 0.2, %v525_v32 }
 0x2dc   :  { %v528_v35 = vsel %vm527_vm15, %v511_v33, %v526_v34 }
 0x2dd   :  { %699 = vmatmul.mubr.msk.f32.vlgmr.msra.gmra.mxu0 %vm344_vm10, %v528_v35 }
 0x39d   :  { %v598_v37 = vpop.f32.mrf.mxu0 }
 0x39e   :  { %v599_v38 = vadd.f32 %v598_v37, %v134_v36 }
 0x39f   :  { %v700_v39 = vpop.f32.mrf.mxu0 }
 0x3a0   :  { %v602_v41 = vmax.f32 %v599_v38, 0.0 }
 0x3a2   :  { %v603_v42 = vmul.f32 %v602_v41, %v135_v40 }
 0x3a4   :  { %v605_v43 = vsel %vm604_vm0, %v603_v42, 0.0 }
 0x3a5   :  { %606 = vadd.xlane.f32.xlu0 %v605_v43 }
 0x42e   :  { %v607_v45 = vpop.xlane.xlu0 %606 }
 0x42f   :  { %v608_v46 = vadd.f32 %v607_v45, %v136_v44 }
 0x431   :  { %610 = vst.msk [vmem:[%s1209_s2] sm:$0x3] %vm609_vm1, %v608_v46 }

</bundles_post_ra>
